<compile_context>
chip_gen: v5e
topology: v5e:2x2
jax: 0.10.0
libtpu: 0.0.40
codegen_flags: <defaults>
</compile_context>

<pallas_src>
import numpy as np
import jax
import jax.numpy as jnp
from jax.experimental import pallas as pl
from jax.experimental.pallas import tpu as pltpu


def _pair(v):
    if isinstance(v, int):
        return (v, v)
    if len(v) == 2:
        return (int(v[0]), int(v[1]))
    raise ValueError("expected int or tuple of 2 ints")


def _build_scatter_matrix(n_in, n_out, k, s, p, d):
    """A[o, i] = number of kernel taps mapping input i to output o.

    Entries are small non-negative integers (they can exceed 1 when taps
    overlap, i.e. stride < dilation*(kernel-1)+1); the sum-of-all-ones-taps
    math remains exact either way (and exact in bf16 for small counts).
    """
    o = np.arange(n_out)[:, None]
    i = np.arange(n_in)[None, :]
    a = np.zeros((n_out, n_in), dtype=np.float32)
    for kk in range(k):
        a += (o == (i * s - p + d * kk)).astype(np.float32)
    return a


def _tpu_tuning():
    """Best-effort generation-aware knobs:
    (tensorcores_per_chip, per-step block byte budget, VMEM request cap)."""
    # Conservative defaults (v7x-like: 2 TCs per chip, 64 MiB VMEM per core).
    n_cores, block_budget, vmem_req_cap = 2, 5 << 20, 40 << 20
    try:
        kind = jax.devices()[0].device_kind.lower()
    except Exception:
        kind = ""
    if "v6" in kind:
        # v6e: 1 TensorCore, 128 MiB VMEM -> bigger blocks, higher VMEM cap.
        n_cores, block_budget, vmem_req_cap = 1, 10 << 20, 48 << 20
    elif "v5 lite" in kind or "v5lite" in kind or "v5e" in kind:
        # v5e: 1 TensorCore, 128 MiB VMEM.
        n_cores, block_budget, vmem_req_cap = 1, 10 << 20, 48 << 20
    try:
        # Never request more than ~60% of physical VMEM when it is queryable.
        cap = int(pltpu.get_tpu_info().vmem_capacity_bytes)
        vmem_req_cap = min(vmem_req_cap, int(0.6 * cap))
    except Exception:
        pass
    return n_cores, block_budget, vmem_req_cap


def _choose_batch_tile(n, per_sample_bytes, block_budget, n_cores):
    """Largest divisor of n whose (in+out) block fits the budget, while
    keeping >= 2 grid steps per TensorCore when the batch allows it
    (megacore sharding on v7x + cross-iteration DMA/compute overlap within
    each core).  With the raised block budget this also makes the folded
    matmul M dimension (TB*D_in) reach the MXU height (128 on v5e, 256 on
    v6e/v7x) for realistic batch sizes.
    """
    cap = max(1, block_budget // max(int(per_sample_bytes), 1))
    if n >= 2 * n_cores:
        cap = min(cap, n // (2 * n_cores))
    elif n >= n_cores:
        cap = min(cap, max(1, n // n_cores))
    cap = max(1, min(cap, n))
    tb = 1
    for d in range(1, cap + 1):
        if n % d == 0:
            tb = d
    return tb


def _make_unpool_kernel(tb, fold_batch):
    """Build the Unpool kernel body for a static per-step sample tile `tb`."""

    def kernel(x_ref, awt_ref, ad_ref, o_ref):
        # x_ref:   (TB, D_in,  W*T)      input samples, native T-last layout
        # awt_ref: (W*T, W_out*T)        (A_W kron I_T)^T  -> width scatter
        # ad_ref:  (D_out, D_in)         depth scatter (weight_scale folded in)
        # o_ref:   (TB, D_out, W_out*T)  lane-dense output block
        awt = awt_ref[...]
        ad = ad_ref[...]
        if fold_batch:
            d_in, wt = x_ref.shape[1], x_ref.shape[2]
            wot = awt.shape[1]
            d_out = ad.shape[0]
            # (1) Width scatter as ONE MXU matmul with the sample tile folded
            #     into M: (TB*D_in, WT) @ (WT, WoT).  Fills the systolic array
            #     instead of TB tiny D_in-row passes (free reshape: D_in is a
            #     sublane-tile multiple, checked by the wrapper).
            x2 = x_ref[...].reshape(tb * d_in, wt)
            y = jnp.dot(x2, awt, preferred_element_type=jnp.float32)
            y = y.astype(x2.dtype).reshape(tb, d_in, wot)
            # (2) Depth scatter batched over the sample tile: one dot_general
            #     push/drain sequence and ONE lane-dense store per grid step.
            ad_b = jnp.broadcast_to(ad[None, :, :], (tb, d_out, d_in))
            out = jnp.einsum("bod,bdw->bow", ad_b, y,
                             preferred_element_type=jnp.float32)
            o_ref[...] = out.astype(o_ref.dtype)
        else:
            # Fallback (D_in not sublane-aligned): per-sample matmuls.
            for b in range(tb):
                y = jnp.dot(x_ref[b], awt, preferred_element_type=jnp.float32)
                o_ref[b] = jnp.dot(ad, y.astype(ad.dtype),
                                   preferred_element_type=jnp.float32
                                   ).astype(o_ref.dtype)

    return kernel


def unpool_forward(x, kernel_size, stride=None, padding=0, dilation=1,
                   weight_scale=1.0, operand_dtype=None):
    """Pallas implementation of Unpool.forward.

    x: (N, C, H, W, T) float32 -> (N, C, H_out, W_out, T) float32.
    operand_dtype: dtype for x and the scatter matrices inside the kernel
        (default float32 = bit-faithful to the PyTorch op; jnp.bfloat16 halves
        HBM traffic and uses the native bf16 MXU path, accumulation stays f32).
    """
    kh, kw = _pair(kernel_size)
    sh, sw = (kh, kw) if stride is None else _pair(stride)
    ph, pw = _pair(padding)
    dh, dw = _pair(dilation)

    N, C, H, W, T = x.shape
    D_in = C * H
    D_out = (D_in - 1) * sh - 2 * ph + dh * (kh - 1) + 1
    W_out = (W - 1) * sw - 2 * pw + dw * (kw - 1) + 1
    if D_out % C != 0:
        raise ValueError("output depth not divisible by channel count "
                         "(same restriction as the PyTorch reshape)")

    WT = W * T
    WoT = W_out * T
    op_dtype = jnp.dtype(jnp.float32 if operand_dtype is None else operand_dtype)

    # Depth scatter with the constant weight scale folded in (absorbed into
    # the MXU matmul -> no per-step scale pass).
    a_d = jnp.asarray(
        float(weight_scale) * _build_scatter_matrix(D_in, D_out, kh, sh, ph, dh),
        dtype=op_dtype)                                             # (D_out, D_in)
    # Width scatter, Kronecker'd with I_T so (W, T) / (W_out, T) stay flattened
    # in native row-major order -> no transposes, lane-dense output block.
    a_w = _build_scatter_matrix(W, W_out, kw, sw, pw, dw)           # (W_out, W)
    a_wt_t = jnp.asarray(np.kron(a_w, np.eye(T, dtype=np.float32)).T,
                         dtype=op_dtype)                            # (W*T, W_out*T)

    # Free row-major reshape (no transpose): (N, C, H, W, T) -> (N, C*H, W*T)
    xb = x.reshape(N, D_in, WT).astype(op_dtype)

    n_cores, block_budget, vmem_req_cap = _tpu_tuning()

    in_block_bytes = D_in * WT * op_dtype.itemsize
    out_block_bytes = D_out * WoT * 4                   # output stays float32
    tb = _choose_batch_tile(N, in_block_bytes + out_block_bytes,
                            block_budget, n_cores)
    grid = (N // tb,)

    # The in-kernel (TB, D_in, WT) -> (TB*D_in, WT) fold is a free
    # (layout-preserving) reshape only when D_in is a multiple of the sublane
    # tile (8 rows of 32-bit, i.e. 8 for f32 / 16 for bf16).
    sublane = 8 * (4 // op_dtype.itemsize)
    fold_batch = (D_in % sublane == 0)

    a_bytes = int(a_d.size + a_wt_t.size) * op_dtype.itemsize
    vmem_est = (2 * tb * (in_block_bytes + out_block_bytes)  # double-buffered blocks
                + 2 * a_bytes                                # scatter matrices
                + (4 << 20))                                 # compiler headroom
    vmem_limit = int(min(max(vmem_est, 8 << 20), vmem_req_cap))
    if vmem_est > vmem_limit:       # never request less than we actually need
        vmem_limit = int(vmem_est)

    cost = pl.CostEstimate(
        flops=int(2 * N * (D_in * WT * WoT + D_out * D_in * WoT)),
        transcendentals=0,
        bytes_accessed=int(xb.size * op_dtype.itemsize + N * D_out * WoT * 4
                           + a_bytes),
    )

    kernel = _make_unpool_kernel(tb, fold_batch)

    def call(single_buffer_constants):
        const_kwargs = ({"pipeline_mode": pl.Buffered(1)}
                        if single_buffer_constants else {})
        in_specs = [
            pl.BlockSpec((tb, D_in, WT), lambda g: (g, 0, 0)),
            pl.BlockSpec((WT, WoT), lambda g: (0, 0), **const_kwargs),
            pl.BlockSpec((D_out, D_in), lambda g: (0, 0), **const_kwargs),
        ]
        return pl.pallas_call(
            kernel,
            out_shape=jax.ShapeDtypeStruct((N, D_out, WoT), jnp.float32),
            grid=grid,
            in_specs=in_specs,
            out_specs=pl.BlockSpec((tb, D_out, WoT), lambda g: (g, 0, 0)),
            compiler_params=pltpu.CompilerParams(
                dimension_semantics=("parallel",),
                vmem_limit_bytes=vmem_limit,
            ),
            cost_estimate=cost,
        )(xb, a_wt_t, a_d)

    try:
        # Constant scatter matrices are fetched once -> single-buffer them.
        out = call(True)
    except Exception:
        # pl.Buffered(1) is an optimization hint only; fall back to default
        # double-buffering if this jaxlib rejects the pipeline_mode kwarg.
        out = call(False)

    # Free row-major reshape back:
    # (N, D_out, W_out*T) -> (N, C, D_out//C, W_out, T)
    return out.reshape(N, C, D_out // C, W_out, T)


def _reference_unpool_numpy(x, kernel_size, stride=None, padding=0, dilation=1,
                            weight_scale=1.0):
    """Direct scatter-based reference of conv_transpose3d with all-ones weight."""
    kh, kw = _pair(kernel_size)
    sh, sw = (kh, kw) if stride is None else _pair(stride)
    ph, pw = _pair(padding)
    dh, dw = _pair(dilation)

    x = np.asarray(x, dtype=np.float32)
    N, C, H, W, T = x.shape
    D_in = C * H
    xr = x.reshape(N, D_in, W, T)
    full_D = (D_in - 1) * sh + dh * (kh - 1) + 1
    full_W = (W - 1) * sw + dw * (kw - 1) + 1
    buf = np.zeros((N, full_D, full_W, T), dtype=np.float32)
    for di in range(D_in):
        for wi in range(W):
            for kd in range(kh):
                for kwi in range(kw):
                    buf[:, di * sh + dh * kd, wi * sw + dw * kwi, :] += \
                        weight_scale * xr[:, di, wi, :]
    out = buf[:, ph:full_D - ph, pw:full_W - pw, :]
    D_out, W_out = out.shape[1], out.shape[2]
    return out.reshape(N, C, D_out // C, W_out, T)


if __name__ == "__main__":
    # Deterministic example: N=16 exercises the batched-matmul fold
    # (TB*D_in >= 128/256) and keeps >= 2 grid steps per TensorCore.
    key = jax.random.PRNGKey(0)
    N, C, H, W, T = 16, 4, 8, 8, 8
    kernel_size = 2
    weight_scale = 2.0   # exercises the scale folding into A_D

    x = jax.random.normal(key, (N, C, H, W, T), dtype=jnp.float32)

    # float32 path (matches the PyTorch conv_transpose3d semantics tightly).
    y = unpool_forward(x, kernel_size, weight_scale=weight_scale)
    y = jax.block_until_ready(y)

    y_ref = _reference_unpool_numpy(np.asarray(x), kernel_size,
                                    weight_scale=weight_scale)
    assert y.shape == (N, C, H * kernel_size, W * kernel_size, T), y.shape
    np.testing.assert_allclose(np.asarray(y), y_ref, rtol=1e-5, atol=1e-5)

    # bf16-operand path (memory-bound kernel: halves HBM bytes, native bf16
    # MXU; scatter matrices are exact in bf16, accumulation stays f32).
    y_bf16 = unpool_forward(x, kernel_size, weight_scale=weight_scale,
                            operand_dtype=jnp.bfloat16)
    y_bf16 = jax.block_until_ready(y_bf16)
    np.testing.assert_allclose(np.asarray(y_bf16), y_ref, rtol=5e-2, atol=5e-2)

    print("KERNEL_OK")
</pallas_src>

<mosaic_0001>
module attributes {stable_mosaic.version = 11 : i64} {
  func.func @kernel(%arg0: i32, %arg1: memref<4x32x64xf32, #tpu.memory_space<vmem>>, %arg2: memref<64x128xf32, #tpu.memory_space<vmem>>, %arg3: memref<64x32xf32, #tpu.memory_space<vmem>>, %arg4: memref<4x64x128xf32, #tpu.memory_space<vmem>>) attributes {dimension_semantics = [#tpu.dimension_semantics<parallel>], iteration_bounds = array<i64: 4>, scalar_prefetch = 0 : i64, scratch_operands = 0 : i64, tpu.core_type = #tpu.core_type<tc>, window_params = [{transform_indices = @transform_0, window_bounds = array<i64: 4, 32, 64>}, {pipeline_mode = #tpu.pipeline_mode<synchronous>, transform_indices = @transform_1, window_bounds = array<i64: 64, 128>}, {pipeline_mode = #tpu.pipeline_mode<synchronous>, transform_indices = @transform_2, window_bounds = array<i64: 64, 32>}, {transform_indices = @transform_3, window_bounds = array<i64: 4, 64, 128>}]} {
    %c0 = arith.constant 0 : index
    %c0_0 = arith.constant 0 : index
    %0 = vector.load %arg2[%c0, %c0_0] : memref<64x128xf32, #tpu.memory_space<vmem>>, vector<64x128xf32>
    %c0_1 = arith.constant 0 : index
    %c0_2 = arith.constant 0 : index
    %1 = vector.load %arg3[%c0_1, %c0_2] : memref<64x32xf32, #tpu.memory_space<vmem>>, vector<64x32xf32>
    %c0_3 = arith.constant 0 : index
    %c0_4 = arith.constant 0 : index
    %c0_5 = arith.constant 0 : index
    %2 = vector.load %arg1[%c0_3, %c0_4, %c0_5] : memref<4x32x64xf32, #tpu.memory_space<vmem>>, vector<4x32x64xf32>
    %3 = vector.shape_cast %2 : vector<4x32x64xf32> to vector<128x64xf32>
    %cst = arith.constant dense<0.000000e+00> : vector<128x128xf32>
    %4 = tpu.matmul %3, %0, %cst {dimension_numbers = #tpu.dot_dimension_numbers<[1], [0], [0], [1], [0, 0, 1, 1], [], []>} : vector<128x64xf32>, vector<64x128xf32>, vector<128x128xf32> -> vector<128x128xf32>
    %5 = vector.shape_cast %4 : vector<128x128xf32> to vector<4x32x128xf32>
    %6 = vector.shape_cast %1 : vector<64x32xf32> to vector<1x64x32xf32>
    %7 = vector.shape_cast %6 : vector<1x64x32xf32> to vector<1x64x32xf32>
    %8 = vector.broadcast %7 : vector<1x64x32xf32> to vector<4x64x32xf32>
    "tpu.trace_start"() <{level = 10 : i32, message = "bod,bdw->bow"}> : () -> ()
    %cst_6 = arith.constant dense<0.000000e+00> : vector<4x64x128xf32>
    %9 = tpu.matmul %8, %5, %cst_6 {dimension_numbers = #tpu.dot_dimension_numbers<[2], [1], [1], [2], [0, 0, 0, 1, 1, 2], [0], [0]>} : vector<4x64x32xf32>, vector<4x32x128xf32>, vector<4x64x128xf32> -> vector<4x64x128xf32>
    "tpu.trace_stop"() : () -> ()
    %c0_7 = arith.constant 0 : index
    %c0_8 = arith.constant 0 : index
    %c0_9 = arith.constant 0 : index
    %10 = vector.load %arg4[%c0_7, %c0_8, %c0_9] : memref<4x64x128xf32, #tpu.memory_space<vmem>>, vector<4x64x128xf32>
    tpu.vector_store %arg4[%c0_7, %c0_8, %c0_9], %9 {strides = array<i32>} : memref<4x64x128xf32, #tpu.memory_space<vmem>>, vector<4x64x128xf32>,
    return
  }
  func.func @transform_0(%arg0: i32) -> (i32, i32, i32) {
    %c0_i32 = arith.constant 0 : i32
    %c0_i32_0 = arith.constant 0 : i32
    %c0_i32_1 = arith.constant 0 : i32
    return %arg0, %c0_i32, %c0_i32_0 : i32, i32, i32
  }
  func.func @transform_1(%arg0: i32) -> (i32, i32) {
    %c0_i32 = arith.constant 0 : i32
    %c0_i32_0 = arith.constant 0 : i32
    %c0_i32_1 = arith.constant 0 : i32
    return %c0_i32, %c0_i32_0 : i32, i32
  }
  func.func @transform_2(%arg0: i32) -> (i32, i32) {
    %c0_i32 = arith.constant 0 : i32
    %c0_i32_0 = arith.constant 0 : i32
    %c0_i32_1 = arith.constant 0 : i32
    return %c0_i32, %c0_i32_0 : i32, i32
  }
  func.func @transform_3(%arg0: i32) -> (i32, i32, i32) {
    %c0_i32 = arith.constant 0 : i32
    %c0_i32_0 = arith.constant 0 : i32
    %c0_i32_1 = arith.constant 0 : i32
    return %arg0, %c0_i32, %c0_i32_0 : i32, i32, i32
  }
}

module attributes {stable_mosaic.version = 11 : i64} {
  func.func @kernel(%arg0: i32, %arg1: memref<4x32x64xf32, #tpu.memory_space<vmem>>, %arg2: memref<64x128xf32, #tpu.memory_space<vmem>>, %arg3: memref<64x32xf32, #tpu.memory_space<vmem>>, %arg4: memref<4x64x128xf32, #tpu.memory_space<vmem>>) attributes {dimension_semantics = [#tpu.dimension_semantics<parallel>], iteration_bounds = array<i64: 4>, scalar_prefetch = 0 : i64, scratch_operands = 0 : i64, tpu.core_type = #tpu.core_type<tc>, window_params = [{transform_indices = @transform_0, window_bounds = array<i64: 4, 32, 64>}, {pipeline_mode = #tpu.pipeline_mode<synchronous>, transform_indices = @transform_1, window_bounds = array<i64: 64, 128>}, {pipeline_mode = #tpu.pipeline_mode<synchronous>, transform_indices = @transform_2, window_bounds = array<i64: 64, 32>}, {transform_indices = @transform_3, window_bounds = array<i64: 4, 64, 128>}]} {
    %c0 = arith.constant 0 : index
    %c0_0 = arith.constant 0 : index
    %0 = vector.load %arg2[%c0, %c0_0] : memref<64x128xf32, #tpu.memory_space<vmem>>, vector<64x128xf32>
    %c0_1 = arith.constant 0 : index
    %c0_2 = arith.constant 0 : index
    %1 = vector.load %arg3[%c0_1, %c0_2] : memref<64x32xf32, #tpu.memory_space<vmem>>, vector<64x32xf32>
    %c0_3 = arith.constant 0 : index
    %c0_4 = arith.constant 0 : index
    %c0_5 = arith.constant 0 : index
    %2 = vector.load %arg1[%c0_3, %c0_4, %c0_5] : memref<4x32x64xf32, #tpu.memory_space<vmem>>, vector<4x32x64xf32>
    %3 = vector.shape_cast %2 : vector<4x32x64xf32> to vector<128x64xf32>
    %cst = arith.constant dense<0.000000e+00> : vector<128x128xf32>
    %4 = tpu.matmul %3, %0, %cst {dimension_numbers = #tpu.dot_dimension_numbers<[1], [0], [0], [1], [0, 0, 1, 1], [], []>} : vector<128x64xf32>, vector<64x128xf32>, vector<128x128xf32> -> vector<128x128xf32>
    %5 = vector.shape_cast %4 : vector<128x128xf32> to vector<4x32x128xf32>
    %6 = vector.shape_cast %1 : vector<64x32xf32> to vector<1x64x32xf32>
    %7 = vector.shape_cast %6 : vector<1x64x32xf32> to vector<1x64x32xf32>
    %8 = vector.broadcast %7 : vector<1x64x32xf32> to vector<4x64x32xf32>
    "tpu.trace_start"() <{level = 10 : i32, message = "bod,bdw->bow"}> : () -> ()
    %cst_6 = arith.constant dense<0.000000e+00> : vector<4x64x128xf32>
    %9 = tpu.matmul %8, %5, %cst_6 {dimension_numbers = #tpu.dot_dimension_numbers<[2], [1], [1], [2], [0, 0, 0, 1, 1, 2], [0], [0]>} : vector<4x64x32xf32>, vector<4x32x128xf32>, vector<4x64x128xf32> -> vector<4x64x128xf32>
    "tpu.trace_stop"() : () -> ()
    %c0_7 = arith.constant 0 : index
    %c0_8 = arith.constant 0 : index
    %c0_9 = arith.constant 0 : index
    %10 = vector.load %arg4[%c0_7, %c0_8, %c0_9] : memref<4x64x128xf32, #tpu.memory_space<vmem>>, vector<4x64x128xf32>
    tpu.vector_store %arg4[%c0_7, %c0_8, %c0_9], %9 {strides = array<i32>} : memref<4x64x128xf32, #tpu.memory_space<vmem>>, vector<4x64x128xf32>,
    return
  }
  func.func @transform_0(%arg0: i32) -> (i32, i32, i32) {
    %c0_i32 = arith.constant 0 : i32
    %c0_i32_0 = arith.constant 0 : i32
    %c0_i32_1 = arith.constant 0 : i32
    return %arg0, %c0_i32, %c0_i32_0 : i32, i32, i32
  }
  func.func @transform_1(%arg0: i32) -> (i32, i32) {
    %c0_i32 = arith.constant 0 : i32
    %c0_i32_0 = arith.constant 0 : i32
    %c0_i32_1 = arith.constant 0 : i32
    return %c0_i32, %c0_i32_0 : i32, i32
  }
  func.func @transform_2(%arg0: i32) -> (i32, i32) {
    %c0_i32 = arith.constant 0 : i32
    %c0_i32_0 = arith.constant 0 : i32
    %c0_i32_1 = arith.constant 0 : i32
    return %c0_i32, %c0_i32_0 : i32, i32
  }
  func.func @transform_3(%arg0: i32) -> (i32, i32, i32) {
    %c0_i32 = arith.constant 0 : i32
    %c0_i32_0 = arith.constant 0 : i32
    %c0_i32_1 = arith.constant 0 : i32
    return %arg0, %c0_i32, %c0_i32_0 : i32, i32, i32
  }
}

</mosaic_0001>

<bundles_post_ra>
// kernel: tpu_custom_call.1
= control target key start
LH: loop header
LB: loop body
LE: loop exit
PB: predicated region body
PF: predicated region fallthrough
CT: control target
= control target key end

     0   :  { %8 = vsyncpa [#allocation3], 0  ;;  %s1178_s0 = inlined_call_operand.hbm [shape: f32[16,32,64], index: 0, kind: input, shape index: {}]   ;;  %s1179_s1 = inlined_call_operand.vmem [shape: f32[64,128], index: 1, kind: input, shape index: {}]   ;;  %s1180_s2 = inlined_call_operand.vmem [shape: f32[64,32], index: 2, kind: input, shape index: {}]   ;;  %s1181_s3 = inlined_call_operand.hbm [shape: f32[16,64,128], index: 3, kind: output, shape index: {}]  }
   0x1   :  { %10 = vsyncpa [#allocation3 + $0x1], 0 }
   0x2   :  { %11 = vsyncpa [#allocation4], 0 }
   0x3   :  { %13 = vsyncpa [#allocation4 + $0x1], 0  ;;  %s903_s12 = smov 0   ;;  %s905_s13 = smov 0  }
   0x4   :  { %s907_s14 = smov 0   ;;  %s909_s15 = smov 0  }
   0x5 LB: > { %s924_s16 = sadd.s32 4294967295, %s877_s15   ;;  %s651_s17 = sadd.s32 4294967294, %s877_s15   ;;  %s877_s15 = sphi %s909_s15, %s1190_s15   ;;  %s873_s14 = sphi %s907_s14, %s1189_s14   ;;  %s869_s13 = sphi %s905_s13, %s1188_s13   ;;  %s865_s12 = sphi %s903_s12, %s1187_s12  }
   0x6   : > { %s928_s18 = sadd.s32 1, %s877_s15   ;;  %s26_s19 = sadd.s32 1, %s873_s14 }
   0x7   : > { %s23_s20 = ssub.s32 %s877_s15, %s928_s18  ;;  %p33_p0 = scmp.ne.s32.totalorder %s873_s14, %s869_s13 }
   0x8   : > { %p24_p1 = scmp.eq.s32.totalorder %s23_s20, 0  ;;  %p34_p2 = scmp.eq.s32.totalorder %s877_s15, 0 }
   0x9   : > { %p39_p3 = scmp.ne.s32.totalorder %s869_s13, %s865_s12  ;;  %p40_p4 = scmp.eq.s32.totalorder %s924_s16, 0 }
   0xa   : > { %s940_s21 = scalar_select %p24_p1, %s873_s14, %s26_s19  }
   0xb   : > { %p942_p5 = por %p34_p2, %p33_p0  ;;  %p946_p6 = por %p40_p4, %p39_p3 }
   0xc   : > { %p105_p7 = scmp.eq.s32.totalorder %s924_s16, 3  ;;  %p111_p8 = scmp.eq.s32.totalorder %s651_s17, 3 }
   0xd   : > { %p743_p9 = scmp.lt.s32.totalorder %s877_s15, 4  ;;  %s137_s26 = sand.u32 1, %s873_s14  }
   0xe   : > { %p952_p10 = por %p105_p7, %p33_p0  ;;  %p956_p11 = por %p111_p8, %p39_p3 }
   0xf   : > { %s716_s27 = sshll.u32 %s877_s15, 7  ;;  %s654_s28 = sshll.u32 %s137_s26, 7 }
  0x10   : > { %s147_s4 = scalar_lea.hbm %s1178_s0, %s716_s27  ;;  %s141_s6 = scalar_lea.vmem [#allocation2], %s654_s28 }
  0x11   : > { %s148_s5 = sshll.u32 %s147_s4, 4  ;;  %s150_s7 = sshll.u32 %s141_s6, 4  ;;  %s149_s5 = int_to_ptr.hbm [resolvable:$true] %s148_s5  ;;  %s151_s7 = int_to_ptr.vmem [resolvable:$true] %s150_s7 }
  0x12   : > { %p967_p12 = pnand %p743_p9, %p942_p5  ;;  %p658_p13 = scmp.ge.s32.totalorder %s877_s15, 1 }
  0x13   : > { %p158_p0 = scmp.lt.s32.totalorder %s877_s15, 5  ;;  %s138_s9 = scalar_lea.sflag [#allocation3], %s137_s26 }
  0x14   : > { %s781_s10 = sshra.s32 %s149_s5, 4  ;;  %p785_p2 = pneg %p967_p12  ;;  %s782_s10 = int_to_ptr.hbm [resolvable:$true] %s781_s10 }
  0x15   : > { %s783_s11 = scalar_lea.hbm %s782_s10, 128  ;;  %s788_s20 = scalar_lea.hbm %s1178_s0, 512 }
  0x16   : > { %p784_p1 = scmp.ne.s32.totalorder %s782_s10, %s783_s11  ;;  %p789_p5 = scmp.lt.s32.totalorder %s782_s10, %s1178_s0 }
  0x17   : > { %p790_p7 = scmp.lt.s32.totalorder %s788_s20, %s783_s11 }
  0x18   : > { %p786_p3 = pnand %p785_p2, %p784_p1 }
  0x19   : > { %p791_p8 = por %p790_p7, %p789_p5 }
  0x1a   : > { %p787_p4 = pneg %p786_p3 }
  0x1c   : > { %p792_p9 = pnand %p791_p8, %p787_p4 }
  0x1e   : > { %795 = shalt.err (!%p792_p9)
}
  0x1f   : > { %s879_s26 = smov 128   ;;  %s880_s28 = smov 8  }
  0x20   : > { %738 = dma.hbm_to_vmem [thread:$0]  (!%p967_p12), %s149_s5, 2048, %s151_s7, %s138_s9, %s879_s26, %s879_s26, %s880_s28  }
  0x21   : > { %p159_p1 = pnand %p658_p13, %p158_p0 }
  0x22   : > { %s988_s29 = sand.u32 (!%p159_p1), 1, %s869_s13  }
  0x23   : > { %162 = sbr.rel (%p159_p1) target bundleno = 470 (0x1d6), region = 32  ;;  %s659_s30 = sshll.u32 (!%p159_p1), %s988_s29, 7 }
  0x24   : > { %s165_s4 = scalar_lea.sflag (!%p159_p1), [#allocation3], %s988_s29  ;;  %s992_s6 = scalar_lea.vmem (!%p159_p1), [#allocation2], %s659_s30 }
  0x28   : > { %856 = dma.done.wait (%p946_p6), %s165_s4, 2048  }
  0x29   : > { %858 = vsyncadd (%p946_p6), %s165_s4, 4294965248  ;;  %v201_v0 = vld [vmem:[%s1179_s1 + $0x38] sm:$0xff]  ;;  %v200_v1 = vld [vmem:[%s1179_s1 + $0x30] sm:$0xff]  ;;  %vm226_vm0 = vcmask 523264   ;;  %vm340_vm1 = vcmask 261120   ;;  %s660_s4 = sshll.u32 %s988_s29, 8 }
  0x2a   : > { %283 = vmatpush.msra.mxu0 %v201_v0  ;;  %719 = vmatpush.msra.mxu2 %v201_v0  ;;  %v199_v2 = vld [vmem:[%s1179_s1 + $0x28] sm:$0xff]  ;;  %v198_v3 = vld [vmem:[%s1179_s1 + $0x20] sm:$0xff]  ;;  %v197_v4 = vld [vmem:[%s1179_s1 + $0x18] sm:$0xff]  ;;  %s1111_s5 = scalar_lea.vmem [#allocation5], %s660_s4  ;;  %s718_s7 = sshll.u32 %s924_s16, 8 }
  0x2b   : > { %v196_v5 = vld [vmem:[%s1179_s1 + $0x10] sm:$0xff]  ;;  %v195_v6 = vld [vmem:[%s1179_s1 + $0x8] sm:$0xff]  ;;  %v194_v7 = vld [vmem:[%s1179_s1] sm:$0xff]  ;;  %s574_s9 = scalar_lea.hbm %s1181_s3, %s718_s7  ;;  %s575_s10 = sshll.u32 %s1111_s5, 4  ;;  %s576_s10 = int_to_ptr.vmem [resolvable:$true] %s575_s10 }
  0x2c   : > { %284 = vmatpush.msra.mxu0 %v200_v1  ;;  %720 = vmatpush.msra.mxu2 %v200_v1  ;;  %v210_v8 = vld [vmem:[%s992_s6] sm:$0xff]  ;;  %v211_v10 = vld [vmem:[%s992_s6 + $0x8] sm:$0xff]  ;;  %v212_v12 = vld [vmem:[%s992_s6 + $0x10] sm:$0xff]  ;;  %s577_s11 = sshll.u32 %s574_s9, 4  ;;  %s562_s17 = scalar_lea.sflag [#allocation4], %s988_s29  ;;  %s578_s11 = int_to_ptr.hbm [resolvable:$true] %s577_s11 }
  0x2d   : > { %v222_v9 = vld [vmem:[%s992_s6 + $0x60] sm:$0xff]  ;;  %v223_v11 = vld [vmem:[%s992_s6 + $0x68] sm:$0xff]  ;;  %v224_v13 = vld [vmem:[%s992_s6 + $0x70] sm:$0xff]  ;;  %s825_s23 = sshra.s32 %s578_s11, 4  ;;  %s831_s22 = scalar_lea.hbm %s1181_s3, 1024  ;;  %s826_s23 = int_to_ptr.hbm [resolvable:$true] %s825_s23 }
  0x2e   : > { %285 = vmatpush.msra.mxu0 %v199_v2  ;;  %721 = vmatpush.msra.mxu2 %v199_v2  ;;  %v213_v14 = vld [vmem:[%s992_s6 + $0x18] sm:$0xff]  ;;  %v214_v16 = vld [vmem:[%s992_s6 + $0x20] sm:$0xff]  ;;  %v215_v17 = vld [vmem:[%s992_s6 + $0x28] sm:$0xff]  ;;  %s827_s19 = scalar_lea.hbm %s826_s23, 256  ;;  %p832_p0 = scmp.lt.s32.totalorder %s826_s23, %s1181_s3 }
  0x2f   : > { %v225_v15 = vld [vmem:[%s992_s6 + $0x78] sm:$0xff]  ;;  %v216_v18 = vld [vmem:[%s992_s6 + $0x30] sm:$0xff]  ;;  %v218_v20 = vld [vmem:[%s992_s6 + $0x40] sm:$0xff]  ;;  %p828_p6 = scmp.ne.s32.totalorder %s826_s23, %s827_s19  ;;  %p833_p2 = scmp.lt.s32.totalorder %s831_s22, %s827_s19 }
  0x30   : > { %286 = vmatpush.msra.mxu0 %v198_v3  ;;  %722 = vmatpush.msra.mxu2 %v198_v3  ;;  %v217_v19 = vld [vmem:[%s992_s6 + $0x38] sm:$0xff]  ;;  %v219_v21 = vld [vmem:[%s992_s6 + $0x48] sm:$0xff]  ;;  %v220_v22 = vld [vmem:[%s992_s6 + $0x50] sm:$0xff] }
  0x31   : > { %v221_v23 = vld [vmem:[%s992_s6 + $0x58] sm:$0xff]  ;;  %v202_v32 = vld [vmem:[%s1180_s2] sm:$0xff]  ;;  %v203_v34 = vld [vmem:[%s1180_s2 + $0x8] sm:$0xff]  ;;  %p829_p12 = pnand %p828_p6, %p952_p10  ;;  %p834_p3 = por %p833_p2, %p832_p0 }
  0x32   : > { %287 = vmatpush.msra.mxu0 %v197_v4  ;;  %723 = vmatpush.msra.mxu2 %v197_v4  ;;  %v207_v35 = vld [vmem:[%s1180_s2 + $0x28] sm:$0xff]  ;;  %v204_v37 = vld [vmem:[%s1180_s2 + $0x10] sm:$0xff]  ;;  %v205_v40 = vld [vmem:[%s1180_s2 + $0x18] sm:$0xff] }
  0x33   : > { %v208_v38 = vld [vmem:[%s1180_s2 + $0x30] sm:$0xff]  ;;  %v209_v41 = vld [vmem:[%s1180_s2 + $0x38] sm:$0xff]  ;;  %v206_v43 = vld [vmem:[%s1180_s2 + $0x20] sm:$0xff]  ;;  %p830_p13 = pneg %p829_p12 }
  0x34   : > { %288 = vmatpush.msra.mxu0 %v196_v5  ;;  %724 = vmatpush.msra.mxu2 %v196_v5 }
  0x35   : > { %p835_p4 = pnand %p834_p3, %p830_p13 }
  0x36   : > { %289 = vmatpush.msra.mxu0 %v195_v6  ;;  %725 = vmatpush.msra.mxu2 %v195_v6 }
  0x38   : > { %290 = vmatpush.msra.mxu0 %v194_v7  ;;  %726 = vmatpush.msra.mxu2 %v194_v7 }
  0x39   : > { %661 = vmatmul.msk.f32.vlgmr.msra.gmra.mxu0 %vm226_vm0, %v210_v8  ;;  %673 = vmatmul.msk.f32.vlgmr.msra.gmra.mxu2 %vm226_vm0, %v222_v9 }
  0x41   : > { %662 = vmatmul.msk.f32.gmra.mxu0 %vm226_vm0, %v211_v10  ;;  %674 = vmatmul.msk.f32.gmra.mxu2 %vm226_vm0, %v223_v11 }
  0x49   : > { %663 = vmatmul.msk.f32.gmra.mxu0 %vm226_vm0, %v212_v12  ;;  %675 = vmatmul.msk.f32.gmra.mxu2 %vm226_vm0, %v224_v13 }
  0x51   : > { %664 = vmatmul.msk.f32.gmra.mxu0 %vm226_vm0, %v213_v14  ;;  %676 = vmatmul.msk.f32.gmra.mxu2 %vm226_vm0, %v225_v15 }
  0x59   : > { %665 = vmatmul.msk.f32.gmra.mxu0 %vm226_vm0, %v214_v16 }
  0x61   : > { %666 = vmatmul.msk.f32.gmra.mxu0 %vm226_vm0, %v215_v17 }
  0x69   : > { %667 = vmatmul.msk.f32.gmra.mxu0 %vm226_vm0, %v216_v18 }
  0x71   : > { %668 = vmatmul.msk.f32.gmra.mxu0 %vm226_vm0, %v217_v19 }
  0x79   : > { %669 = vmatmul.msk.f32.gmra.mxu0 %vm226_vm0, %v218_v20 }
  0x81   : > { %670 = vmatmul.msk.f32.gmra.mxu0 %vm226_vm0, %v219_v21 }
  0x89   : > { %671 = vmatmul.msk.f32.gmra.mxu0 %vm226_vm0, %v220_v22 }
  0x91   : > { %672 = vmatmul.msk.f32.gmra.mxu0 %vm226_vm0, %v221_v23 }
  0xb6   : > { %v292_v24 = vpop.f32.mrf.mxu0 }
  0xbc   : > { %v328_v25 = vpop.f32.mrf.mxu2 }
  0xbe   : > { %v295_v26 = vpop.f32.mrf.mxu0 }
  0xc4   : > { %v331_v27 = vpop.f32.mrf.mxu2 }
  0xc6   : > { %v298_v28 = vpop.f32.mrf.mxu0 }
  0xcc   : > { %v334_v29 = vpop.f32.mrf.mxu2 }
  0xce   : > { %v301_v30 = vpop.f32.mrf.mxu0 }
  0xcf   : > { %377 = vmatpush.msra.mxu1 %v301_v30  ;;  %727 = vmatpush.msra.mxu3 %v301_v30 }
  0xd1   : > { %378 = vmatpush.msra.mxu1 %v298_v28  ;;  %728 = vmatpush.msra.mxu3 %v298_v28 }
  0xd3   : > { %379 = vmatpush.msra.mxu1 %v295_v26  ;;  %729 = vmatpush.msra.mxu3 %v295_v26 }
  0xd4   : > { %v337_v31 = vpop.f32.mrf.mxu2 }
  0xd5   : > { %380 = vmatpush.msra.mxu1 %v292_v24  ;;  %730 = vmatpush.msra.mxu3 %v292_v24 }
  0xd6   : > { %v304_v33 = vpop.f32.mrf.mxu0  ;;  %677 = vmatmul.msk.f32.vlgmr.msra.gmra.mxu1 %vm340_vm1, %v202_v32  ;;  %682 = vmatmul.msk.f32.vlgmr.msra.gmra.mxu3 %vm340_vm1, %v207_v35 }
  0xd7   : > { %500 = vmatpush.msrb.mxu1 %v337_v31 }
  0xd9   : > { %501 = vmatpush.msrb.mxu1 %v334_v29 }
  0xdb   : > { %502 = vmatpush.msrb.mxu1 %v331_v27 }
  0xdd   : > { %503 = vmatpush.msrb.mxu1 %v328_v25 }
  0xde   : > { %v307_v36 = vpop.f32.mrf.mxu0  ;;  %678 = vmatmul.msk.f32.gmra.mxu1 %vm340_vm1, %v203_v34  ;;  %683 = vmatmul.msk.f32.gmra.mxu3 %vm340_vm1, %v208_v38 }
  0xe6   : > { %v310_v39 = vpop.f32.mrf.mxu0  ;;  %679 = vmatmul.msk.f32.gmra.mxu1 %vm340_vm1, %v204_v37  ;;  %684 = vmatmul.msk.f32.gmra.mxu3 %vm340_vm1, %v209_v41 }
  0xee   : > { %v313_v42 = vpop.f32.mrf.mxu0  ;;  %680 = vmatmul.msk.f32.gmra.mxu1 %vm340_vm1, %v205_v40 }
  0xef   : > { %418 = vmatpush.msrb.mxu2 %v313_v42 }
  0xf1   : > { %419 = vmatpush.msrb.mxu2 %v310_v39 }
  0xf3   : > { %420 = vmatpush.msrb.mxu2 %v307_v36 }
  0xf5   : > { %421 = vmatpush.msrb.mxu2 %v304_v33 }
  0xf6   : > { %v316_v44 = vpop.f32.mrf.mxu0  ;;  %685 = vmatmul.msk.f32.vlgmr.msrb.gmra.mxu2 %vm340_vm1, %v202_v32  ;;  %681 = vmatmul.msk.f32.gmra.mxu1 %vm340_vm1, %v206_v43 }
  0xfe   : > { %v319_v45 = vpop.f32.mrf.mxu0  ;;  %686 = vmatmul.msk.f32.gmra.mxu2 %vm340_vm1, %v203_v34  ;;  %701 = vmatmul.msk.f32.vlgmr.msrb.gmra.mxu1 %vm340_vm1, %v202_v32 }
 0x106   : > { %v322_v46 = vpop.f32.mrf.mxu0  ;;  %687 = vmatmul.msk.f32.gmra.mxu2 %vm340_vm1, %v204_v37  ;;  %702 = vmatmul.msk.f32.gmra.mxu1 %vm340_vm1, %v203_v34 }
 0x10e   : > { %v325_v47 = vpop.f32.mrf.mxu0  ;;  %688 = vmatmul.msk.f32.gmra.mxu2 %vm340_vm1, %v205_v40  ;;  %703 = vmatmul.msk.f32.gmra.mxu1 %vm340_vm1, %v204_v37 }
 0x10f   : > { %459 = vmatpush.msrb.mxu3 %v325_v47 }
 0x111   : > { %460 = vmatpush.msrb.mxu3 %v322_v46 }
 0x113   : > { %461 = vmatpush.msrb.mxu3 %v319_v45 }
 0x115   : > { %462 = vmatpush.msrb.mxu3 %v316_v44 }
 0x116   : > { %693 = vmatmul.msk.f32.vlgmr.msrb.gmra.mxu3 %vm340_vm1, %v202_v32  ;;  %689 = vmatmul.msk.f32.gmra.mxu2 %vm340_vm1, %v206_v43 }
 0x117   : > { %704 = vmatmul.msk.f32.gmra.mxu1 %vm340_vm1, %v205_v40 }
 0x11e   : > { %694 = vmatmul.msk.f32.gmra.mxu3 %vm340_vm1, %v203_v34  ;;  %690 = vmatmul.msk.f32.gmra.mxu2 %vm340_vm1, %v207_v35 }
 0x11f   : > { %705 = vmatmul.msk.f32.gmra.mxu1 %vm340_vm1, %v206_v43 }
 0x126   : > { %695 = vmatmul.msk.f32.gmra.mxu3 %vm340_vm1, %v204_v37  ;;  %691 = vmatmul.msk.f32.gmra.mxu2 %vm340_vm1, %v208_v38 }
 0x127   : > { %706 = vmatmul.msk.f32.gmra.mxu1 %vm340_vm1, %v207_v35 }
 0x12e   : > { %696 = vmatmul.msk.f32.gmra.mxu3 %vm340_vm1, %v205_v40  ;;  %692 = vmatmul.msk.f32.gmra.mxu2 %vm340_vm1, %v209_v41 }
 0x12f   : > { %707 = vmatmul.msk.f32.gmra.mxu1 %vm340_vm1, %v208_v38 }
 0x136   : > { %697 = vmatmul.msk.f32.gmra.mxu3 %vm340_vm1, %v206_v43 }
 0x137   : > { %708 = vmatmul.msk.f32.gmra.mxu1 %vm340_vm1, %v209_v41 }
 0x13e   : > { %698 = vmatmul.msk.f32.gmra.mxu3 %vm340_vm1, %v207_v35 }
 0x146   : > { %699 = vmatmul.msk.f32.gmra.mxu3 %vm340_vm1, %v208_v38 }
 0x14e   : > { %700 = vmatmul.msk.f32.gmra.mxu3 %vm340_vm1, %v209_v41 }
 0x153   : > { %v382_v48 = vpop.f32.mrf.mxu1 }
 0x154   : > { %529 = vst [vmem:[%s1111_s5] sm:$0xff] %v382_v48 }
 0x159   : > { %v397_v50 = vpop.f32.mrf.mxu3 }
 0x15a   : > { %534 = vst [vmem:[%s1111_s5 + $0x28] sm:$0xff] %v397_v50 }
 0x15b   : > { %v385_v49 = vpop.f32.mrf.mxu1 }
 0x15c   : > { %530 = vst [vmem:[%s1111_s5 + $0x8] sm:$0xff] %v385_v49 }
 0x161   : > { %v400_v52 = vpop.f32.mrf.mxu3 }
 0x162   : > { %535 = vst [vmem:[%s1111_s5 + $0x30] sm:$0xff] %v400_v52 }
 0x163   : > { %v388_v51 = vpop.f32.mrf.mxu1 }
 0x164   : > { %531 = vst [vmem:[%s1111_s5 + $0x10] sm:$0xff] %v388_v51 }
 0x169   : > { %v403_v54 = vpop.f32.mrf.mxu3 }
 0x16a   : > { %536 = vst [vmem:[%s1111_s5 + $0x38] sm:$0xff] %v403_v54 }
 0x16b   : > { %v391_v53 = vpop.f32.mrf.mxu1 }
 0x16c   : > { %532 = vst [vmem:[%s1111_s5 + $0x18] sm:$0xff] %v391_v53 }
 0x173   : > { %v394_v55 = vpop.f32.mrf.mxu1 }
 0x174   : > { %533 = vst [vmem:[%s1111_s5 + $0x20] sm:$0xff] %v394_v55 }
 0x179   : > { %v423_v56 = vpop.f32.mrf.mxu2 }
 0x17a   : > { %537 = vst [vmem:[%s1111_s5 + $0x40] sm:$0xff] %v423_v56 }
 0x17b   : > { %v505_v57 = vpop.f32.mrf.mxu1 }
 0x17c   : > { %553 = vst [vmem:[%s1111_s5 + $0xc0] sm:$0xff] %v505_v57 }
 0x181   : > { %v426_v58 = vpop.f32.mrf.mxu2 }
 0x182   : > { %538 = vst [vmem:[%s1111_s5 + $0x48] sm:$0xff] %v426_v58 }
 0x183   : > { %v508_v59 = vpop.f32.mrf.mxu1 }
 0x184   : > { %554 = vst [vmem:[%s1111_s5 + $0xc8] sm:$0xff] %v508_v59 }
 0x189   : > { %v429_v60 = vpop.f32.mrf.mxu2 }
 0x18a   : > { %539 = vst [vmem:[%s1111_s5 + $0x50] sm:$0xff] %v429_v60 }
 0x18b   : > { %v511_v61 = vpop.f32.mrf.mxu1 }
 0x18c   : > { %555 = vst [vmem:[%s1111_s5 + $0xd0] sm:$0xff] %v511_v61 }
 0x191   : > { %v432_v62 = vpop.f32.mrf.mxu2 }
 0x192   : > { %540 = vst [vmem:[%s1111_s5 + $0x58] sm:$0xff] %v432_v62 }
 0x194   : > { %v514_v63 = vpop.f32.mrf.mxu1 }
 0x195   : > { %556 = vst [vmem:[%s1111_s5 + $0xd8] sm:$0xff] %v514_v63 }
 0x199   : > { %v464_v0 = vpop.f32.mrf.mxu3  ;;  %v435_v1 = vpop.f32.mrf.mxu2 }
 0x19a   : > { %545 = vst [vmem:[%s1111_s5 + $0x80] sm:$0xff] %v464_v0 }
 0x19b   : > { %541 = vst [vmem:[%s1111_s5 + $0x60] sm:$0xff] %v435_v1 }
 0x19c   : > { %v517_v2 = vpop.f32.mrf.mxu1 }
 0x19d   : > { %557 = vst [vmem:[%s1111_s5 + $0xe0] sm:$0xff] %v517_v2 }
 0x1a1   : > { %v467_v3 = vpop.f32.mrf.mxu3  ;;  %v438_v4 = vpop.f32.mrf.mxu2 }
 0x1a2   : > { %546 = vst [vmem:[%s1111_s5 + $0x88] sm:$0xff] %v467_v3 }
 0x1a3   : > { %542 = vst [vmem:[%s1111_s5 + $0x68] sm:$0xff] %v438_v4 }
 0x1a4   : > { %v520_v5 = vpop.f32.mrf.mxu1 }
 0x1a5   : > { %558 = vst [vmem:[%s1111_s5 + $0xe8] sm:$0xff] %v520_v5 }
 0x1a9   : > { %v470_v6 = vpop.f32.mrf.mxu3  ;;  %v441_v7 = vpop.f32.mrf.mxu2 }
 0x1aa   : > { %547 = vst [vmem:[%s1111_s5 + $0x90] sm:$0xff] %v470_v6 }
 0x1ab   : > { %543 = vst [vmem:[%s1111_s5 + $0x70] sm:$0xff] %v441_v7 }
 0x1ac   : > { %v523_v8 = vpop.f32.mrf.mxu1 }
 0x1ad   : > { %559 = vst [vmem:[%s1111_s5 + $0xf0] sm:$0xff] %v523_v8 }
 0x1b1   : > { %v473_v9 = vpop.f32.mrf.mxu3  ;;  %v444_v10 = vpop.f32.mrf.mxu2 }
 0x1b2   : > { %548 = vst [vmem:[%s1111_s5 + $0x98] sm:$0xff] %v473_v9 }
 0x1b3   : > { %544 = vst [vmem:[%s1111_s5 + $0x78] sm:$0xff] %v444_v10 }
 0x1b4   : > { %v526_v11 = vpop.f32.mrf.mxu1 }
 0x1b5   : > { %560 = vst [vmem:[%s1111_s5 + $0xf8] sm:$0xff] %v526_v11 }
 0x1b9   : > { %v476_v12 = vpop.f32.mrf.mxu3 }
 0x1ba   : > { %549 = vst [vmem:[%s1111_s5 + $0xa0] sm:$0xff] %v476_v12 }
 0x1c1   : > { %v479_v13 = vpop.f32.mrf.mxu3 }
 0x1c2   : > { %550 = vst [vmem:[%s1111_s5 + $0xa8] sm:$0xff] %v479_v13 }
 0x1c9   : > { %v482_v14 = vpop.f32.mrf.mxu3 }
 0x1ca   : > { %551 = vst [vmem:[%s1111_s5 + $0xb0] sm:$0xff] %v482_v14 }
 0x1d1   : > { %v485_v15 = vpop.f32.mrf.mxu3 }
 0x1d2   : > { %552 = vst [vmem:[%s1111_s5 + $0xb8] sm:$0xff] %v485_v15 }
 0x1d3   : > { %838 = shalt.err (!%p835_p4)
}
 0x1d4   : > { %s881_s29 = smov 128   ;;  %s882_s28 = smov 8  }
 0x1d5   : > { %733 = dma.vmem_to_hbm [thread:$0]  (%p952_p10), %s576_s10, 4096, %s578_s11, %s562_s17, %s881_s29, %s881_s29, %s882_s28  }
 0x1d6 PF: > { %p744_p5 = scmp.ge.s32.totalorder %s877_s15, 2  ;;  %s592_s30 = sand.u32 1, %s865_s12  }
 0x1d7   : > { %s593_s4 = scalar_lea.sflag [#allocation4], %s592_s30 }
 0x1d8   : > { %p740_p7 = pnand %p744_p5, %p956_p11 }
 0x1da   : > { %p741_p8 = pneg %p740_p7 }
 0x1dc   : > { %860 = dma.done.wait (%p741_p8), %s593_s4, 4096  }
 0x1dd   : > { %862 = vsyncadd (%p741_p8), %s593_s4, 4294963200  ;;  %p16_p9 = scmp.ge.s32.totalorder %s928_s18, 6   ;;  %s1187_s12 = smov %s869_s13 }
 0x1de   : > { %s1188_s13 = smov %s873_s14  ;;  %s1189_s14 = smov %s940_s21 }
 0x1df   : > { %s1190_s15 = smov %s928_s18  ;;  %18 = sbr.rel (!%p16_p9) target bundleno = 5 (0x5), region = 77 }
 0x1e4   :  { %599 = vsyncpa [#allocation3], 1 }
 0x1e5   :  { %601 = vsyncpa [#allocation3 + $0x1], 1 }
 0x1e6   :  { %602 = vsyncpa [#allocation4], 1 }
 0x1e7   :  { %604 = vsyncpa [#allocation4 + $0x1], 1 }

// kernel: tpu_custom_call.1
= control target key start
LH: loop header
LB: loop body
LE: loop exit
PB: predicated region body
PF: predicated region fallthrough
CT: control target
= control target key end

     0   :  { %8 = vsyncpa [#allocation3], 0  ;;  %s1178_s0 = inlined_call_operand.hbm [shape: f32[16,32,64], index: 0, kind: input, shape index: {}]   ;;  %s1179_s1 = inlined_call_operand.vmem [shape: f32[64,128], index: 1, kind: input, shape index: {}]   ;;  %s1180_s2 = inlined_call_operand.vmem [shape: f32[64,32], index: 2, kind: input, shape index: {}]   ;;  %s1181_s3 = inlined_call_operand.hbm [shape: f32[16,64,128], index: 3, kind: output, shape index: {}]  }
   0x1   :  { %10 = vsyncpa [#allocation3 + $0x1], 0 }
   0x2   :  { %11 = vsyncpa [#allocation4], 0 }
   0x3   :  { %13 = vsyncpa [#allocation4 + $0x1], 0  ;;  %s903_s12 = smov 0   ;;  %s905_s13 = smov 0  }
   0x4   :  { %s907_s14 = smov 0   ;;  %s909_s15 = smov 0  }
   0x5 LB: > { %s924_s16 = sadd.s32 4294967295, %s877_s15   ;;  %s651_s17 = sadd.s32 4294967294, %s877_s15   ;;  %s877_s15 = sphi %s909_s15, %s1190_s15   ;;  %s873_s14 = sphi %s907_s14, %s1189_s14   ;;  %s869_s13 = sphi %s905_s13, %s1188_s13   ;;  %s865_s12 = sphi %s903_s12, %s1187_s12  }
   0x6   : > { %s928_s18 = sadd.s32 1, %s877_s15   ;;  %s26_s19 = sadd.s32 1, %s873_s14 }
   0x7   : > { %s23_s20 = ssub.s32 %s877_s15, %s928_s18  ;;  %p33_p0 = scmp.ne.s32.totalorder %s873_s14, %s869_s13 }
   0x8   : > { %p24_p1 = scmp.eq.s32.totalorder %s23_s20, 0  ;;  %p34_p2 = scmp.eq.s32.totalorder %s877_s15, 0 }
   0x9   : > { %p39_p3 = scmp.ne.s32.totalorder %s869_s13, %s865_s12  ;;  %p40_p4 = scmp.eq.s32.totalorder %s924_s16, 0 }
   0xa   : > { %s940_s21 = scalar_select %p24_p1, %s873_s14, %s26_s19  }
   0xb   : > { %p942_p5 = por %p34_p2, %p33_p0  ;;  %p946_p6 = por %p40_p4, %p39_p3 }
   0xc   : > { %p105_p7 = scmp.eq.s32.totalorder %s924_s16, 3  ;;  %p111_p8 = scmp.eq.s32.totalorder %s651_s17, 3 }
   0xd   : > { %p743_p9 = scmp.lt.s32.totalorder %s877_s15, 4  ;;  %s137_s26 = sand.u32 1, %s873_s14  }
   0xe   : > { %p952_p10 = por %p105_p7, %p33_p0  ;;  %p956_p11 = por %p111_p8, %p39_p3 }
   0xf   : > { %s716_s27 = sshll.u32 %s877_s15, 7  ;;  %s654_s28 = sshll.u32 %s137_s26, 7 }
  0x10   : > { %s147_s4 = scalar_lea.hbm %s1178_s0, %s716_s27  ;;  %s141_s6 = scalar_lea.vmem [#allocation2], %s654_s28 }
  0x11   : > { %s148_s5 = sshll.u32 %s147_s4, 4  ;;  %s150_s7 = sshll.u32 %s141_s6, 4  ;;  %s149_s5 = int_to_ptr.hbm [resolvable:$true] %s148_s5  ;;  %s151_s7 = int_to_ptr.vmem [resolvable:$true] %s150_s7 }
  0x12   : > { %p967_p12 = pnand %p743_p9, %p942_p5  ;;  %p658_p13 = scmp.ge.s32.totalorder %s877_s15, 1 }
  0x13   : > { %p158_p0 = scmp.lt.s32.totalorder %s877_s15, 5  ;;  %s138_s9 = scalar_lea.sflag [#allocation3], %s137_s26 }
  0x14   : > { %s781_s10 = sshra.s32 %s149_s5, 4  ;;  %p785_p2 = pneg %p967_p12  ;;  %s782_s10 = int_to_ptr.hbm [resolvable:$true] %s781_s10 }
  0x15   : > { %s783_s11 = scalar_lea.hbm %s782_s10, 128  ;;  %s788_s20 = scalar_lea.hbm %s1178_s0, 512 }
  0x16   : > { %p784_p1 = scmp.ne.s32.totalorder %s782_s10, %s783_s11  ;;  %p789_p5 = scmp.lt.s32.totalorder %s782_s10, %s1178_s0 }
  0x17   : > { %p790_p7 = scmp.lt.s32.totalorder %s788_s20, %s783_s11 }
  0x18   : > { %p786_p3 = pnand %p785_p2, %p784_p1 }
  0x19   : > { %p791_p8 = por %p790_p7, %p789_p5 }
  0x1a   : > { %p787_p4 = pneg %p786_p3 }
  0x1c   : > { %p792_p9 = pnand %p791_p8, %p787_p4 }
  0x1e   : > { %795 = shalt.err (!%p792_p9)
}
  0x1f   : > { %s879_s26 = smov 128   ;;  %s880_s28 = smov 8  }
  0x20   : > { %738 = dma.hbm_to_vmem [thread:$0]  (!%p967_p12), %s149_s5, 2048, %s151_s7, %s138_s9, %s879_s26, %s879_s26, %s880_s28  }
  0x21   : > { %p159_p1 = pnand %p658_p13, %p158_p0 }
  0x22   : > { %s988_s29 = sand.u32 (!%p159_p1), 1, %s869_s13  }
  0x23   : > { %162 = sbr.rel (%p159_p1) target bundleno = 470 (0x1d6), region = 32  ;;  %s659_s30 = sshll.u32 (!%p159_p1), %s988_s29, 7 }
  0x24   : > { %s165_s4 = scalar_lea.sflag (!%p159_p1), [#allocation3], %s988_s29  ;;  %s992_s6 = scalar_lea.vmem (!%p159_p1), [#allocation2], %s659_s30 }
  0x28   : > { %856 = dma.done.wait (%p946_p6), %s165_s4, 2048  }
  0x29   : > { %858 = vsyncadd (%p946_p6), %s165_s4, 4294965248  ;;  %v201_v0 = vld [vmem:[%s1179_s1 + $0x38] sm:$0xff]  ;;  %v200_v1 = vld [vmem:[%s1179_s1 + $0x30] sm:$0xff]  ;;  %vm226_vm0 = vcmask 523264   ;;  %vm340_vm1 = vcmask 261120   ;;  %s660_s4 = sshll.u32 %s988_s29, 8 }
  0x2a   : > { %283 = vmatpush.msra.mxu0 %v201_v0  ;;  %719 = vmatpush.msra.mxu2 %v201_v0  ;;  %v199_v2 = vld [vmem:[%s1179_s1 + $0x28] sm:$0xff]  ;;  %v198_v3 = vld [vmem:[%s1179_s1 + $0x20] sm:$0xff]  ;;  %v197_v4 = vld [vmem:[%s1179_s1 + $0x18] sm:$0xff]  ;;  %s1111_s5 = scalar_lea.vmem [#allocation5], %s660_s4  ;;  %s718_s7 = sshll.u32 %s924_s16, 8 }
  0x2b   : > { %v196_v5 = vld [vmem:[%s1179_s1 + $0x10] sm:$0xff]  ;;  %v195_v6 = vld [vmem:[%s1179_s1 + $0x8] sm:$0xff]  ;;  %v194_v7 = vld [vmem:[%s1179_s1] sm:$0xff]  ;;  %s574_s9 = scalar_lea.hbm %s1181_s3, %s718_s7  ;;  %s575_s10 = sshll.u32 %s1111_s5, 4  ;;  %s576_s10 = int_to_ptr.vmem [resolvable:$true] %s575_s10 }
  0x2c   : > { %284 = vmatpush.msra.mxu0 %v200_v1  ;;  %720 = vmatpush.msra.mxu2 %v200_v1  ;;  %v210_v8 = vld [vmem:[%s992_s6] sm:$0xff]  ;;  %v211_v10 = vld [vmem:[%s992_s6 + $0x8] sm:$0xff]  ;;  %v212_v12 = vld [vmem:[%s992_s6 + $0x10] sm:$0xff]  ;;  %s577_s11 = sshll.u32 %s574_s9, 4  ;;  %s562_s17 = scalar_lea.sflag [#allocation4], %s988_s29  ;;  %s578_s11 = int_to_ptr.hbm [resolvable:$true] %s577_s11 }
  0x2d   : > { %v222_v9 = vld [vmem:[%s992_s6 + $0x60] sm:$0xff]  ;;  %v223_v11 = vld [vmem:[%s992_s6 + $0x68] sm:$0xff]  ;;  %v224_v13 = vld [vmem:[%s992_s6 + $0x70] sm:$0xff]  ;;  %s825_s23 = sshra.s32 %s578_s11, 4  ;;  %s831_s22 = scalar_lea.hbm %s1181_s3, 1024  ;;  %s826_s23 = int_to_ptr.hbm [resolvable:$true] %s825_s23 }
  0x2e   : > { %285 = vmatpush.msra.mxu0 %v199_v2  ;;  %721 = vmatpush.msra.mxu2 %v199_v2  ;;  %v213_v14 = vld [vmem:[%s992_s6 + $0x18] sm:$0xff]  ;;  %v214_v16 = vld [vmem:[%s992_s6 + $0x20] sm:$0xff]  ;;  %v215_v17 = vld [vmem:[%s992_s6 + $0x28] sm:$0xff]  ;;  %s827_s19 = scalar_lea.hbm %s826_s23, 256  ;;  %p832_p0 = scmp.lt.s32.totalorder %s826_s23, %s1181_s3 }
  0x2f   : > { %v225_v15 = vld [vmem:[%s992_s6 + $0x78] sm:$0xff]  ;;  %v216_v18 = vld [vmem:[%s992_s6 + $0x30] sm:$0xff]  ;;  %v218_v20 = vld [vmem:[%s992_s6 + $0x40] sm:$0xff]  ;;  %p828_p6 = scmp.ne.s32.totalorder %s826_s23, %s827_s19  ;;  %p833_p2 = scmp.lt.s32.totalorder %s831_s22, %s827_s19 }
  0x30   : > { %286 = vmatpush.msra.mxu0 %v198_v3  ;;  %722 = vmatpush.msra.mxu2 %v198_v3  ;;  %v217_v19 = vld [vmem:[%s992_s6 + $0x38] sm:$0xff]  ;;  %v219_v21 = vld [vmem:[%s992_s6 + $0x48] sm:$0xff]  ;;  %v220_v22 = vld [vmem:[%s992_s6 + $0x50] sm:$0xff] }
  0x31   : > { %v221_v23 = vld [vmem:[%s992_s6 + $0x58] sm:$0xff]  ;;  %v202_v32 = vld [vmem:[%s1180_s2] sm:$0xff]  ;;  %v203_v34 = vld [vmem:[%s1180_s2 + $0x8] sm:$0xff]  ;;  %p829_p12 = pnand %p828_p6, %p952_p10  ;;  %p834_p3 = por %p833_p2, %p832_p0 }
  0x32   : > { %287 = vmatpush.msra.mxu0 %v197_v4  ;;  %723 = vmatpush.msra.mxu2 %v197_v4  ;;  %v207_v35 = vld [vmem:[%s1180_s2 + $0x28] sm:$0xff]  ;;  %v204_v37 = vld [vmem:[%s1180_s2 + $0x10] sm:$0xff]  ;;  %v205_v40 = vld [vmem:[%s1180_s2 + $0x18] sm:$0xff] }
  0x33   : > { %v208_v38 = vld [vmem:[%s1180_s2 + $0x30] sm:$0xff]  ;;  %v209_v41 = vld [vmem:[%s1180_s2 + $0x38] sm:$0xff]  ;;  %v206_v43 = vld [vmem:[%s1180_s2 + $0x20] sm:$0xff]  ;;  %p830_p13 = pneg %p829_p12 }
  0x34   : > { %288 = vmatpush.msra.mxu0 %v196_v5  ;;  %724 = vmatpush.msra.mxu2 %v196_v5 }
  0x35   : > { %p835_p4 = pnand %p834_p3, %p830_p13 }
  0x36   : > { %289 = vmatpush.msra.mxu0 %v195_v6  ;;  %725 = vmatpush.msra.mxu2 %v195_v6 }
  0x38   : > { %290 = vmatpush.msra.mxu0 %v194_v7  ;;  %726 = vmatpush.msra.mxu2 %v194_v7 }
  0x39   : > { %661 = vmatmul.msk.f32.vlgmr.msra.gmra.mxu0 %vm226_vm0, %v210_v8  ;;  %673 = vmatmul.msk.f32.vlgmr.msra.gmra.mxu2 %vm226_vm0, %v222_v9 }
  0x41   : > { %662 = vmatmul.msk.f32.gmra.mxu0 %vm226_vm0, %v211_v10  ;;  %674 = vmatmul.msk.f32.gmra.mxu2 %vm226_vm0, %v223_v11 }
  0x49   : > { %663 = vmatmul.msk.f32.gmra.mxu0 %vm226_vm0, %v212_v12  ;;  %675 = vmatmul.msk.f32.gmra.mxu2 %vm226_vm0, %v224_v13 }
  0x51   : > { %664 = vmatmul.msk.f32.gmra.mxu0 %vm226_vm0, %v213_v14  ;;  %676 = vmatmul.msk.f32.gmra.mxu2 %vm226_vm0, %v225_v15 }
  0x59   : > { %665 = vmatmul.msk.f32.gmra.mxu0 %vm226_vm0, %v214_v16 }
  0x61   : > { %666 = vmatmul.msk.f32.gmra.mxu0 %vm226_vm0, %v215_v17 }
  0x69   : > { %667 = vmatmul.msk.f32.gmra.mxu0 %vm226_vm0, %v216_v18 }
  0x71   : > { %668 = vmatmul.msk.f32.gmra.mxu0 %vm226_vm0, %v217_v19 }
  0x79   : > { %669 = vmatmul.msk.f32.gmra.mxu0 %vm226_vm0, %v218_v20 }
  0x81   : > { %670 = vmatmul.msk.f32.gmra.mxu0 %vm226_vm0, %v219_v21 }
  0x89   : > { %671 = vmatmul.msk.f32.gmra.mxu0 %vm226_vm0, %v220_v22 }
  0x91   : > { %672 = vmatmul.msk.f32.gmra.mxu0 %vm226_vm0, %v221_v23 }
  0xb6   : > { %v292_v24 = vpop.f32.mrf.mxu0 }
  0xbc   : > { %v328_v25 = vpop.f32.mrf.mxu2 }
  0xbe   : > { %v295_v26 = vpop.f32.mrf.mxu0 }
  0xc4   : > { %v331_v27 = vpop.f32.mrf.mxu2 }
  0xc6   : > { %v298_v28 = vpop.f32.mrf.mxu0 }
  0xcc   : > { %v334_v29 = vpop.f32.mrf.mxu2 }
  0xce   : > { %v301_v30 = vpop.f32.mrf.mxu0 }
  0xcf   : > { %377 = vmatpush.msra.mxu1 %v301_v30  ;;  %727 = vmatpush.msra.mxu3 %v301_v30 }
  0xd1   : > { %378 = vmatpush.msra.mxu1 %v298_v28  ;;  %728 = vmatpush.msra.mxu3 %v298_v28 }
  0xd3   : > { %379 = vmatpush.msra.mxu1 %v295_v26  ;;  %729 = vmatpush.msra.mxu3 %v295_v26 }
  0xd4   : > { %v337_v31 = vpop.f32.mrf.mxu2 }
  0xd5   : > { %380 = vmatpush.msra.mxu1 %v292_v24  ;;  %730 = vmatpush.msra.mxu3 %v292_v24 }
  0xd6   : > { %v304_v33 = vpop.f32.mrf.mxu0  ;;  %677 = vmatmul.msk.f32.vlgmr.msra.gmra.mxu1 %vm340_vm1, %v202_v32  ;;  %682 = vmatmul.msk.f32.vlgmr.msra.gmra.mxu3 %vm340_vm1, %v207_v35 }
  0xd7   : > { %500 = vmatpush.msrb.mxu1 %v337_v31 }
  0xd9   : > { %501 = vmatpush.msrb.mxu1 %v334_v29 }
  0xdb   : > { %502 = vmatpush.msrb.mxu1 %v331_v27 }
  0xdd   : > { %503 = vmatpush.msrb.mxu1 %v328_v25 }
  0xde   : > { %v307_v36 = vpop.f32.mrf.mxu0  ;;  %678 = vmatmul.msk.f32.gmra.mxu1 %vm340_vm1, %v203_v34  ;;  %683 = vmatmul.msk.f32.gmra.mxu3 %vm340_vm1, %v208_v38 }
  0xe6   : > { %v310_v39 = vpop.f32.mrf.mxu0  ;;  %679 = vmatmul.msk.f32.gmra.mxu1 %vm340_vm1, %v204_v37  ;;  %684 = vmatmul.msk.f32.gmra.mxu3 %vm340_vm1, %v209_v41 }
  0xee   : > { %v313_v42 = vpop.f32.mrf.mxu0  ;;  %680 = vmatmul.msk.f32.gmra.mxu1 %vm340_vm1, %v205_v40 }
  0xef   : > { %418 = vmatpush.msrb.mxu2 %v313_v42 }
  0xf1   : > { %419 = vmatpush.msrb.mxu2 %v310_v39 }
  0xf3   : > { %420 = vmatpush.msrb.mxu2 %v307_v36 }
  0xf5   : > { %421 = vmatpush.msrb.mxu2 %v304_v33 }
  0xf6   : > { %v316_v44 = vpop.f32.mrf.mxu0  ;;  %685 = vmatmul.msk.f32.vlgmr.msrb.gmra.mxu2 %vm340_vm1, %v202_v32  ;;  %681 = vmatmul.msk.f32.gmra.mxu1 %vm340_vm1, %v206_v43 }
  0xfe   : > { %v319_v45 = vpop.f32.mrf.mxu0  ;;  %686 = vmatmul.msk.f32.gmra.mxu2 %vm340_vm1, %v203_v34  ;;  %701 = vmatmul.msk.f32.vlgmr.msrb.gmra.mxu1 %vm340_vm1, %v202_v32 }
 0x106   : > { %v322_v46 = vpop.f32.mrf.mxu0  ;;  %687 = vmatmul.msk.f32.gmra.mxu2 %vm340_vm1, %v204_v37  ;;  %702 = vmatmul.msk.f32.gmra.mxu1 %vm340_vm1, %v203_v34 }
 0x10e   : > { %v325_v47 = vpop.f32.mrf.mxu0  ;;  %688 = vmatmul.msk.f32.gmra.mxu2 %vm340_vm1, %v205_v40  ;;  %703 = vmatmul.msk.f32.gmra.mxu1 %vm340_vm1, %v204_v37 }
 0x10f   : > { %459 = vmatpush.msrb.mxu3 %v325_v47 }
 0x111   : > { %460 = vmatpush.msrb.mxu3 %v322_v46 }
 0x113   : > { %461 = vmatpush.msrb.mxu3 %v319_v45 }
 0x115   : > { %462 = vmatpush.msrb.mxu3 %v316_v44 }
 0x116   : > { %693 = vmatmul.msk.f32.vlgmr.msrb.gmra.mxu3 %vm340_vm1, %v202_v32  ;;  %689 = vmatmul.msk.f32.gmra.mxu2 %vm340_vm1, %v206_v43 }
 0x117   : > { %704 = vmatmul.msk.f32.gmra.mxu1 %vm340_vm1, %v205_v40 }
 0x11e   : > { %694 = vmatmul.msk.f32.gmra.mxu3 %vm340_vm1, %v203_v34  ;;  %690 = vmatmul.msk.f32.gmra.mxu2 %vm340_vm1, %v207_v35 }
 0x11f   : > { %705 = vmatmul.msk.f32.gmra.mxu1 %vm340_vm1, %v206_v43 }
 0x126   : > { %695 = vmatmul.msk.f32.gmra.mxu3 %vm340_vm1, %v204_v37  ;;  %691 = vmatmul.msk.f32.gmra.mxu2 %vm340_vm1, %v208_v38 }
 0x127   : > { %706 = vmatmul.msk.f32.gmra.mxu1 %vm340_vm1, %v207_v35 }
 0x12e   : > { %696 = vmatmul.msk.f32.gmra.mxu3 %vm340_vm1, %v205_v40  ;;  %692 = vmatmul.msk.f32.gmra.mxu2 %vm340_vm1, %v209_v41 }
 0x12f   : > { %707 = vmatmul.msk.f32.gmra.mxu1 %vm340_vm1, %v208_v38 }
 0x136   : > { %697 = vmatmul.msk.f32.gmra.mxu3 %vm340_vm1, %v206_v43 }
 0x137   : > { %708 = vmatmul.msk.f32.gmra.mxu1 %vm340_vm1, %v209_v41 }
 0x13e   : > { %698 = vmatmul.msk.f32.gmra.mxu3 %vm340_vm1, %v207_v35 }
 0x146   : > { %699 = vmatmul.msk.f32.gmra.mxu3 %vm340_vm1, %v208_v38 }
 0x14e   : > { %700 = vmatmul.msk.f32.gmra.mxu3 %vm340_vm1, %v209_v41 }
 0x153   : > { %v382_v48 = vpop.f32.mrf.mxu1 }
 0x154   : > { %529 = vst [vmem:[%s1111_s5] sm:$0xff] %v382_v48 }
 0x159   : > { %v397_v50 = vpop.f32.mrf.mxu3 }
 0x15a   : > { %534 = vst [vmem:[%s1111_s5 + $0x28] sm:$0xff] %v397_v50 }
 0x15b   : > { %v385_v49 = vpop.f32.mrf.mxu1 }
 0x15c   : > { %530 = vst [vmem:[%s1111_s5 + $0x8] sm:$0xff] %v385_v49 }
 0x161   : > { %v400_v52 = vpop.f32.mrf.mxu3 }
 0x162   : > { %535 = vst [vmem:[%s1111_s5 + $0x30] sm:$0xff] %v400_v52 }
 0x163   : > { %v388_v51 = vpop.f32.mrf.mxu1 }
 0x164   : > { %531 = vst [vmem:[%s1111_s5 + $0x10] sm:$0xff] %v388_v51 }
 0x169   : > { %v403_v54 = vpop.f32.mrf.mxu3 }
 0x16a   : > { %536 = vst [vmem:[%s1111_s5 + $0x38] sm:$0xff] %v403_v54 }
 0x16b   : > { %v391_v53 = vpop.f32.mrf.mxu1 }
 0x16c   : > { %532 = vst [vmem:[%s1111_s5 + $0x18] sm:$0xff] %v391_v53 }
 0x173   : > { %v394_v55 = vpop.f32.mrf.mxu1 }
 0x174   : > { %533 = vst [vmem:[%s1111_s5 + $0x20] sm:$0xff] %v394_v55 }
 0x179   : > { %v423_v56 = vpop.f32.mrf.mxu2 }
 0x17a   : > { %537 = vst [vmem:[%s1111_s5 + $0x40] sm:$0xff] %v423_v56 }
 0x17b   : > { %v505_v57 = vpop.f32.mrf.mxu1 }
 0x17c   : > { %553 = vst [vmem:[%s1111_s5 + $0xc0] sm:$0xff] %v505_v57 }
 0x181   : > { %v426_v58 = vpop.f32.mrf.mxu2 }
 0x182   : > { %538 = vst [vmem:[%s1111_s5 + $0x48] sm:$0xff] %v426_v58 }
 0x183   : > { %v508_v59 = vpop.f32.mrf.mxu1 }
 0x184   : > { %554 = vst [vmem:[%s1111_s5 + $0xc8] sm:$0xff] %v508_v59 }
 0x189   : > { %v429_v60 = vpop.f32.mrf.mxu2 }
 0x18a   : > { %539 = vst [vmem:[%s1111_s5 + $0x50] sm:$0xff] %v429_v60 }
 0x18b   : > { %v511_v61 = vpop.f32.mrf.mxu1 }
 0x18c   : > { %555 = vst [vmem:[%s1111_s5 + $0xd0] sm:$0xff] %v511_v61 }
 0x191   : > { %v432_v62 = vpop.f32.mrf.mxu2 }
 0x192   : > { %540 = vst [vmem:[%s1111_s5 + $0x58] sm:$0xff] %v432_v62 }
 0x194   : > { %v514_v63 = vpop.f32.mrf.mxu1 }
 0x195   : > { %556 = vst [vmem:[%s1111_s5 + $0xd8] sm:$0xff] %v514_v63 }
 0x199   : > { %v464_v0 = vpop.f32.mrf.mxu3  ;;  %v435_v1 = vpop.f32.mrf.mxu2 }
 0x19a   : > { %545 = vst [vmem:[%s1111_s5 + $0x80] sm:$0xff] %v464_v0 }
 0x19b   : > { %541 = vst [vmem:[%s1111_s5 + $0x60] sm:$0xff] %v435_v1 }
 0x19c   : > { %v517_v2 = vpop.f32.mrf.mxu1 }
 0x19d   : > { %557 = vst [vmem:[%s1111_s5 + $0xe0] sm:$0xff] %v517_v2 }
 0x1a1   : > { %v467_v3 = vpop.f32.mrf.mxu3  ;;  %v438_v4 = vpop.f32.mrf.mxu2 }
 0x1a2   : > { %546 = vst [vmem:[%s1111_s5 + $0x88] sm:$0xff] %v467_v3 }
 0x1a3   : > { %542 = vst [vmem:[%s1111_s5 + $0x68] sm:$0xff] %v438_v4 }
 0x1a4   : > { %v520_v5 = vpop.f32.mrf.mxu1 }
 0x1a5   : > { %558 = vst [vmem:[%s1111_s5 + $0xe8] sm:$0xff] %v520_v5 }
 0x1a9   : > { %v470_v6 = vpop.f32.mrf.mxu3  ;;  %v441_v7 = vpop.f32.mrf.mxu2 }
 0x1aa   : > { %547 = vst [vmem:[%s1111_s5 + $0x90] sm:$0xff] %v470_v6 }
 0x1ab   : > { %543 = vst [vmem:[%s1111_s5 + $0x70] sm:$0xff] %v441_v7 }
 0x1ac   : > { %v523_v8 = vpop.f32.mrf.mxu1 }
 0x1ad   : > { %559 = vst [vmem:[%s1111_s5 + $0xf0] sm:$0xff] %v523_v8 }
 0x1b1   : > { %v473_v9 = vpop.f32.mrf.mxu3  ;;  %v444_v10 = vpop.f32.mrf.mxu2 }
 0x1b2   : > { %548 = vst [vmem:[%s1111_s5 + $0x98] sm:$0xff] %v473_v9 }
 0x1b3   : > { %544 = vst [vmem:[%s1111_s5 + $0x78] sm:$0xff] %v444_v10 }
 0x1b4   : > { %v526_v11 = vpop.f32.mrf.mxu1 }
 0x1b5   : > { %560 = vst [vmem:[%s1111_s5 + $0xf8] sm:$0xff] %v526_v11 }
 0x1b9   : > { %v476_v12 = vpop.f32.mrf.mxu3 }
 0x1ba   : > { %549 = vst [vmem:[%s1111_s5 + $0xa0] sm:$0xff] %v476_v12 }
 0x1c1   : > { %v479_v13 = vpop.f32.mrf.mxu3 }
 0x1c2   : > { %550 = vst [vmem:[%s1111_s5 + $0xa8] sm:$0xff] %v479_v13 }
 0x1c9   : > { %v482_v14 = vpop.f32.mrf.mxu3 }
 0x1ca   : > { %551 = vst [vmem:[%s1111_s5 + $0xb0] sm:$0xff] %v482_v14 }
 0x1d1   : > { %v485_v15 = vpop.f32.mrf.mxu3 }
 0x1d2   : > { %552 = vst [vmem:[%s1111_s5 + $0xb8] sm:$0xff] %v485_v15 }
 0x1d3   : > { %838 = shalt.err (!%p835_p4)
}
 0x1d4   : > { %s881_s29 = smov 128   ;;  %s882_s28 = smov 8  }
 0x1d5   : > { %733 = dma.vmem_to_hbm [thread:$0]  (%p952_p10), %s576_s10, 4096, %s578_s11, %s562_s17, %s881_s29, %s881_s29, %s882_s28  }
 0x1d6 PF: > { %p744_p5 = scmp.ge.s32.totalorder %s877_s15, 2  ;;  %s592_s30 = sand.u32 1, %s865_s12  }
 0x1d7   : > { %s593_s4 = scalar_lea.sflag [#allocation4], %s592_s30 }
 0x1d8   : > { %p740_p7 = pnand %p744_p5, %p956_p11 }
 0x1da   : > { %p741_p8 = pneg %p740_p7 }
 0x1dc   : > { %860 = dma.done.wait (%p741_p8), %s593_s4, 4096  }
 0x1dd   : > { %862 = vsyncadd (%p741_p8), %s593_s4, 4294963200  ;;  %p16_p9 = scmp.ge.s32.totalorder %s928_s18, 6   ;;  %s1187_s12 = smov %s869_s13 }
 0x1de   : > { %s1188_s13 = smov %s873_s14  ;;  %s1189_s14 = smov %s940_s21 }
 0x1df   : > { %s1190_s15 = smov %s928_s18  ;;  %18 = sbr.rel (!%p16_p9) target bundleno = 5 (0x5), region = 77 }
 0x1e4   :  { %599 = vsyncpa [#allocation3], 1 }
 0x1e5   :  { %601 = vsyncpa [#allocation3 + $0x1], 1 }
 0x1e6   :  { %602 = vsyncpa [#allocation4], 1 }
 0x1e7   :  { %604 = vsyncpa [#allocation4 + $0x1], 1 }

</bundles_post_ra>
